<compile_context>
chip_gen: v7x
topology: tpu7x:2x2x1
jax: 0.10.0
libtpu: 0.0.40
codegen_flags: <defaults>
</compile_context>

<pallas_src>
import functools

import jax
import jax.numpy as jnp
from jax.experimental import pallas as pl
from jax.experimental.pallas import tpu as pltpu

# encoding.WeatherQuantityEncodingV1.CHAR_MAX_VALUE assumed to be 127.
CHAR_MAX_VALUE = 127
VOCAB = CHAR_MAX_VALUE + 1


def _pad8(n):
    return ((n + 7) // 8) * 8


def _area_kernel(idx_ref, edata_ref, meta_ref, qmeaning_ref, slab_ref, out_ref,
                 *, P, N, L, V, M, EM, Q, S, off):
    """Per-area forward: one grid step processes all P*N entries of area `a`
    and emits that area's contribution (1, S) to the timespan meaning."""
    PN = P * N

    # ---- QuantityInterpreterV1 (batched over the area's PN entries) --------
    # Character histogram: accumulate equality masks in int32, convert once.
    idx = idx_ref[0]                                             # (PN, L) i32
    lane_iota = jax.lax.broadcasted_iota(jnp.int32, (PN, V), 1)  # (PN, V)
    counts = jnp.zeros((PN, V), jnp.int32)
    for l in range(L):                                           # static L
        counts = counts + (lane_iota == idx[:, l:l + 1]).astype(jnp.int32)
    counts_f = counts.astype(jnp.float32)                        # one convert

    # Static slices into the packed weight slab (views, no extra DMA).
    fq = slab_ref[off["fq"]:off["fq"] + V, :M]      # (V, M)  emb@Wq.T / L
    bq = slab_ref[off["bq"]:off["bq"] + 1, :M]      # (1, M)
    wed = slab_ref[off["wed"]:off["wed"] + 1, :EM]  # (1, EM) entry-data col
    weq = slab_ref[off["weq"]:off["weq"] + M, :EM]  # (M, EM) entry-qty cols
    be = slab_ref[off["be"]:off["be"] + 1, :EM]     # (1, EM)
    wtpe = slab_ref[off["wtpe"]:off["wtpe"] + EM, :S]   # (EM, S) fused tail
    wtpm = slab_ref[off["wtpm"]:off["wtpm"] + 3, :S]    # (3, S)  fused tail
    wtpq = slab_ref[off["wtpq"]:off["wtpq"] + Q, :S]    # (Q, S)  fused tail
    bias = slab_ref[off["bias"]:off["bias"] + 1, :S]    # (1, S)  fused bias

    # mean_l(emb[idx]) @ Wq.T + bq, as a single (PN, V) @ (V, M) matmul.
    qmean = jnp.dot(counts_f, fq, preferred_element_type=jnp.float32) + bq

    # ---- EntryInterpreterV1: concat replaced by split-weight decomposition -
    entry = (edata_ref[0] * wed
             + jnp.dot(qmean, weq, preferred_element_type=jnp.float32)
             + be)                                               # (PN, EM)

    # ---- Affine tail (TimePoint -> Area -> Timespan), collapsed ------------
    # Means commute with the affine layers (fixed dense shapes), so only the
    # global per-area means are needed (cheap sublane reductions).
    entry_mean = jnp.sum(entry, axis=0, keepdims=True) * (1.0 / PN)   # (1,EM)
    meta_mean = jnp.sum(meta_ref[0], axis=0, keepdims=True) * (1.0 / P)  # (1,3)

    out = (jnp.dot(entry_mean, wtpe, preferred_element_type=jnp.float32)
           + jnp.dot(meta_mean, wtpm, preferred_element_type=jnp.float32)
           + jnp.dot(qmeaning_ref[...], wtpq,
                     preferred_element_type=jnp.float32)
           + bias)                                               # (1, S)
    out_ref[0] = out


def prepare_timespan_params(params, L):
    """One-time weight glue: fold the quantity embedding, the affine tail and
    all biases, and pack everything into a single lane-padded VMEM slab."""
    emb = jnp.asarray(params["char_embedding"], jnp.float32)     # (V, E)
    Wq = jnp.asarray(params["quantity_w"], jnp.float32)          # (M, E)
    bq = jnp.asarray(params["quantity_b"], jnp.float32)          # (M,)
    We = jnp.asarray(params["entry_w"], jnp.float32)             # (EM, EM)
    be = jnp.asarray(params["entry_b"], jnp.float32)             # (EM,)
    Wtp = jnp.asarray(params["time_point_w"], jnp.float32)       # (T, EM+Q+3)
    btp = jnp.asarray(params["time_point_b"], jnp.float32)       # (T,)
    Wa = jnp.asarray(params["area_w"], jnp.float32)              # (Da, T)
    ba = jnp.asarray(params["area_b"], jnp.float32)              # (Da,)
    Ws = jnp.asarray(params["timespan_w"], jnp.float32)          # (S, Da)
    bs = jnp.asarray(params["timespan_b"], jnp.float32)          # (S,)

    V = emb.shape[0]
    M = Wq.shape[0]
    EM = 1 + M
    Q = 3 + M
    S = Ws.shape[0]

    fused_q = (emb @ Wq.T) * (1.0 / L)                           # (V, M)
    wed = We[:, :1].T                                            # (1, EM)
    weq = We[:, 1:].T                                            # (M, EM)
    tail = Wa.T @ Ws.T                                           # (T, S)
    wtpe_f = Wtp[:, :EM].T @ tail                                # (EM, S)
    wtpq_f = Wtp[:, EM:EM + Q].T @ tail                          # (Q, S)
    wtpm_f = Wtp[:, EM + Q:].T @ tail                            # (3, S)
    bias_f = btp[None, :] @ tail + ba[None, :] @ Ws.T + bs[None, :]  # (1, S)

    segs = dict(fq=fused_q, bq=bq[None, :], wed=wed, weq=weq, be=be[None, :],
                wtpe=wtpe_f, wtpm=wtpm_f, wtpq=wtpq_f, bias=bias_f)
    max_cols = max(a.shape[1] for a in segs.values())
    lane = max(128, ((max_cols + 127) // 128) * 128)

    off = {}
    row = 0
    for name, a in segs.items():
        off[name] = row
        row = _pad8(row + a.shape[0])
    rows = _pad8(row)

    slab = jnp.zeros((rows, lane), jnp.float32)
    for name, a in segs.items():
        slab = slab.at[off[name]:off[name] + a.shape[0], :a.shape[1]].set(a)

    dims = dict(V=V, M=M, EM=EM, Q=Q, S=S)
    return slab, off, dims


def make_weather_timespan_interpreter(params, A, P, N, L):
    """Returns a jitted forward(quantity_idx, entry_data, tp_meta, query_meaning)."""
    slab, off, dims = prepare_timespan_params(params, L)
    V, M, EM, Q, S = dims["V"], dims["M"], dims["EM"], dims["Q"], dims["S"]
    PN = P * N

    kernel = functools.partial(_area_kernel, P=P, N=N, L=L,
                               V=V, M=M, EM=EM, Q=Q, S=S, off=off)

    call = pl.pallas_call(
        kernel,
        grid=(A,),
        in_specs=[
            pl.BlockSpec((1, PN, L), lambda a: (a, 0, 0)),   # char indices
            pl.BlockSpec((1, PN, 1), lambda a: (a, 0, 0)),   # entry data
            pl.BlockSpec((1, P, 3), lambda a: (a, 0, 0)),    # time-point meta
            pl.BlockSpec((1, Q), lambda a: (0, 0)),          # query meaning
            pl.BlockSpec(slab.shape, lambda a: (0, 0)),      # packed weights
        ],
        out_specs=pl.BlockSpec((1, 1, S), lambda a: (a, 0, 0)),
        out_shape=jax.ShapeDtypeStruct((A, 1, S), jnp.float32),
        compiler_params=pltpu.CompilerParams(
            dimension_semantics=("parallel",),
            vmem_limit_bytes=32 * 1024 * 1024),
    )

    @jax.jit
    def forward(quantity_idx, entry_data, tp_meta, query_meaning):
        idx = quantity_idx.astype(jnp.int32).reshape(A, PN, L)
        edata = entry_data.astype(jnp.float32).reshape(A, PN, 1)
        meta = tp_meta.astype(jnp.float32).reshape(A, P, 3)
        qmeaning = query_meaning.astype(jnp.float32).reshape(1, Q)
        area_out = call(idx, edata, meta, qmeaning, slab)    # (A, 1, S)
        return jnp.mean(area_out[:, 0, :], axis=0)           # (S,)

    return forward


def _reference(quantity_idx, entry_data, tp_meta, query_meaning, params):
    """Literal per-object JAX port of the PyTorch forward (loops + concats)."""
    emb = params["char_embedding"]
    Wq, bq = params["quantity_w"], params["quantity_b"]
    We, be = params["entry_w"], params["entry_b"]
    Wtp, btp = params["time_point_w"], params["time_point_b"]
    Wa, ba = params["area_w"], params["area_b"]
    Ws, bs = params["timespan_w"], params["timespan_b"]
    A, P, N, L = quantity_idx.shape
    M = Wq.shape[0]
    Q = 3 + M

    def quantity(idx):
        e = emb[idx]                                   # (L, E)
        return jnp.mean(e, axis=0) @ Wq.T + bq         # (M,)

    def entry(a, p, n):
        qm = quantity(quantity_idx[a, p, n])
        x = jnp.concatenate([entry_data[a, p, n], qm])  # (1+M,)
        return x @ We.T + be

    def time_point(a, p):
        ents = jnp.stack([entry(a, p, n) for n in range(N)])   # (N, 1+M)
        meta = tp_meta[a, p]
        cat = jnp.concatenate(
            [ents,
             jnp.broadcast_to(query_meaning, (N, Q)),
             jnp.broadcast_to(meta, (N, 3))], axis=1)
        return jnp.mean(cat, axis=0) @ Wtp.T + btp              # (T,)

    def area(a):
        tps = jnp.stack([time_point(a, p) for p in range(P)])  # (P, T)
        return jnp.mean(tps @ Wa.T + ba, axis=0)                # (Da,)

    areas = jnp.stack([area(a) for a in range(A)])              # (A, Da)
    return jnp.mean(areas @ Ws.T + bs, axis=0)                  # (S,)


if __name__ == "__main__":
    M = 32          # quantity_meaning_dim
    E = 32          # char_embedding_dim (defaults to quantity_meaning_dim)
    T = 32          # weather_time_point_meaning_dim
    Da = 32         # weather_time_area_meaning_dim
    S = 32          # weather_timespan_meaning_dim
    A, P, N, L = 2, 2, 3, 8   # areas, time points/area, entries/point, chars
    EM = 1 + M
    Q = 3 + M
    Dtp_in = EM + Q + 3       # 71

    key = jax.random.PRNGKey(0)
    keys = jax.random.split(key, 16)

    def linear(kw, kb, out_f, in_f):
        bound = 1.0 / (in_f ** 0.5)
        w = jax.random.uniform(kw, (out_f, in_f), minval=-bound, maxval=bound,
                               dtype=jnp.float32)
        b = jax.random.uniform(kb, (out_f,), minval=-bound, maxval=bound,
                               dtype=jnp.float32)
        return w, b

    emb = jax.random.normal(keys[0], (VOCAB, E), dtype=jnp.float32)
    Wq, bq = linear(keys[1], keys[2], M, E)
    We, be = linear(keys[3], keys[4], EM, EM)
    Wtp, btp = linear(keys[5], keys[6], T, Dtp_in)
    Wa, ba = linear(keys[7], keys[8], Da, T)
    Ws, bs = linear(keys[9], keys[10], S, Da)
    params = dict(char_embedding=emb, quantity_w=Wq, quantity_b=bq,
                  entry_w=We, entry_b=be,
                  time_point_w=Wtp, time_point_b=btp,
                  area_w=Wa, area_b=ba,
                  timespan_w=Ws, timespan_b=bs)

    quantity_idx = jax.random.randint(keys[11], (A, P, N, L), 0, VOCAB,
                                      dtype=jnp.int32)
    entry_data = jax.random.normal(keys[12], (A, P, N, 1), dtype=jnp.float32)
    tp_meta = jax.random.normal(keys[13], (A, P, 3), dtype=jnp.float32)
    query_meaning = jax.random.normal(keys[14], (Q,), dtype=jnp.float32)

    forward = make_weather_timespan_interpreter(params, A, P, N, L)
    out = forward(quantity_idx, entry_data, tp_meta, query_meaning)
    out = jax.block_until_ready(out)

    ref = _reference(quantity_idx, entry_data, tp_meta, query_meaning, params)
    assert out.shape == (S,)
    assert jnp.allclose(out, ref, atol=1e-4, rtol=1e-4), \
        float(jnp.max(jnp.abs(out - ref)))

    print("KERNEL_OK")
</pallas_src>

<mosaic_0001>
module attributes {stable_mosaic.version = 11 : i64} {
  func.func @_area_kernel(%arg0: i32, %arg1: memref<1x6x8xi32, #tpu.memory_space<vmem>>, %arg2: memref<1x6x1xf32, #tpu.memory_space<vmem>>, %arg3: memref<1x2x3xf32, #tpu.memory_space<vmem>>, %arg4: memref<1x35xf32, #tpu.memory_space<vmem>>, %arg5: memref<280x128xf32, #tpu.memory_space<vmem>>, %arg6: memref<1x1x32xf32, #tpu.memory_space<vmem>>) attributes {dimension_semantics = [#tpu.dimension_semantics<parallel>], iteration_bounds = array<i64: 2>, scalar_prefetch = 0 : i64, scratch_operands = 0 : i64, tpu.core_type = #tpu.core_type<tc>, window_params = [{transform_indices = @transform_0, window_bounds = array<i64: 1, 6, 8>}, {transform_indices = @transform_1, window_bounds = array<i64: 1, 6, 1>}, {transform_indices = @transform_2, window_bounds = array<i64: 1, 2, 3>}, {pipeline_mode = #tpu.pipeline_mode<synchronous>, transform_indices = @transform_3, window_bounds = array<i64: 1, 35>}, {pipeline_mode = #tpu.pipeline_mode<synchronous>, transform_indices = @transform_4, window_bounds = array<i64: 280, 128>}, {transform_indices = @transform_5, window_bounds = array<i64: 1, 1, 32>}]} {
    %c0 = arith.constant 0 : index
    %c0_0 = arith.constant 0 : index
    %c0_1 = arith.constant 0 : index
    %0 = vector.load %arg1[%c0, %c0_0, %c0_1] : memref<1x6x8xi32, #tpu.memory_space<vmem>>, vector<1x6x8xi32>
    %1 = vector.shape_cast %0 : vector<1x6x8xi32> to vector<6x8xi32>
    %2 = tpu.iota {dimensions = array<i32: 1>} : vector<6x128xi32>
    %c0_i32 = arith.constant 0 : i32
    %3 = vector.broadcast %c0_i32 : i32 to vector<6x128xi32>
    %4 = vector.extract_strided_slice %1 {offsets = [0, 0], sizes = [6, 1], strides = [1, 1]} : vector<6x8xi32> to vector<6x1xi32>
    %5 = vector.broadcast %4 : vector<6x1xi32> to vector<6x128xi32>
    %6 = arith.cmpi eq, %2, %5 : vector<6x128xi32>
    %7 = arith.extui %6 : vector<6x128xi1> to vector<6x128xi32>
    %8 = arith.addi %3, %7 : vector<6x128xi32>
    %9 = vector.extract_strided_slice %1 {offsets = [0, 1], sizes = [6, 1], strides = [1, 1]} : vector<6x8xi32> to vector<6x1xi32>
    %10 = vector.broadcast %9 : vector<6x1xi32> to vector<6x128xi32>
    %11 = arith.cmpi eq, %2, %10 : vector<6x128xi32>
    %12 = arith.extui %11 : vector<6x128xi1> to vector<6x128xi32>
    %13 = arith.addi %8, %12 : vector<6x128xi32>
    %14 = vector.extract_strided_slice %1 {offsets = [0, 2], sizes = [6, 1], strides = [1, 1]} : vector<6x8xi32> to vector<6x1xi32>
    %15 = vector.broadcast %14 : vector<6x1xi32> to vector<6x128xi32>
    %16 = arith.cmpi eq, %2, %15 : vector<6x128xi32>
    %17 = arith.extui %16 : vector<6x128xi1> to vector<6x128xi32>
    %18 = arith.addi %13, %17 : vector<6x128xi32>
    %19 = vector.extract_strided_slice %1 {offsets = [0, 3], sizes = [6, 1], strides = [1, 1]} : vector<6x8xi32> to vector<6x1xi32>
    %20 = vector.broadcast %19 : vector<6x1xi32> to vector<6x128xi32>
    %21 = arith.cmpi eq, %2, %20 : vector<6x128xi32>
    %22 = arith.extui %21 : vector<6x128xi1> to vector<6x128xi32>
    %23 = arith.addi %18, %22 : vector<6x128xi32>
    %24 = vector.extract_strided_slice %1 {offsets = [0, 4], sizes = [6, 1], strides = [1, 1]} : vector<6x8xi32> to vector<6x1xi32>
    %25 = vector.broadcast %24 : vector<6x1xi32> to vector<6x128xi32>
    %26 = arith.cmpi eq, %2, %25 : vector<6x128xi32>
    %27 = arith.extui %26 : vector<6x128xi1> to vector<6x128xi32>
    %28 = arith.addi %23, %27 : vector<6x128xi32>
    %29 = vector.extract_strided_slice %1 {offsets = [0, 5], sizes = [6, 1], strides = [1, 1]} : vector<6x8xi32> to vector<6x1xi32>
    %30 = vector.broadcast %29 : vector<6x1xi32> to vector<6x128xi32>
    %31 = arith.cmpi eq, %2, %30 : vector<6x128xi32>
    %32 = arith.extui %31 : vector<6x128xi1> to vector<6x128xi32>
    %33 = arith.addi %28, %32 : vector<6x128xi32>
    %34 = vector.extract_strided_slice %1 {offsets = [0, 6], sizes = [6, 1], strides = [1, 1]} : vector<6x8xi32> to vector<6x1xi32>
    %35 = vector.broadcast %34 : vector<6x1xi32> to vector<6x128xi32>
    %36 = arith.cmpi eq, %2, %35 : vector<6x128xi32>
    %37 = arith.extui %36 : vector<6x128xi1> to vector<6x128xi32>
    %38 = arith.addi %33, %37 : vector<6x128xi32>
    %39 = vector.extract_strided_slice %1 {offsets = [0, 7], sizes = [6, 1], strides = [1, 1]} : vector<6x8xi32> to vector<6x1xi32>
    %40 = vector.broadcast %39 : vector<6x1xi32> to vector<6x128xi32>
    %41 = arith.cmpi eq, %2, %40 : vector<6x128xi32>
    %42 = arith.extui %41 : vector<6x128xi1> to vector<6x128xi32>
    %43 = arith.addi %38, %42 : vector<6x128xi32>
    %44 = arith.sitofp %43 : vector<6x128xi32> to vector<6x128xf32>
    %c0_2 = arith.constant 0 : index
    %c0_3 = arith.constant 0 : index
    %45 = vector.load %arg5[%c0_2, %c0_3] : memref<280x128xf32, #tpu.memory_space<vmem>>, vector<128x32xf32>
    %c128 = arith.constant 128 : index
    %c0_4 = arith.constant 0 : index
    %46 = vector.load %arg5[%c128, %c0_4] : memref<280x128xf32, #tpu.memory_space<vmem>>, vector<1x32xf32>
    %c136 = arith.constant 136 : index
    %c0_5 = arith.constant 0 : index
    %47 = vector.load %arg5[%c136, %c0_5] : memref<280x128xf32, #tpu.memory_space<vmem>>, vector<1x33xf32>
    %c144 = arith.constant 144 : index
    %c0_6 = arith.constant 0 : index
    %48 = vector.load %arg5[%c144, %c0_6] : memref<280x128xf32, #tpu.memory_space<vmem>>, vector<32x33xf32>
    %c176 = arith.constant 176 : index
    %c0_7 = arith.constant 0 : index
    %49 = vector.load %arg5[%c176, %c0_7] : memref<280x128xf32, #tpu.memory_space<vmem>>, vector<1x33xf32>
    %c184 = arith.constant 184 : index
    %c0_8 = arith.constant 0 : index
    %50 = vector.load %arg5[%c184, %c0_8] : memref<280x128xf32, #tpu.memory_space<vmem>>, vector<33x32xf32>
    %c224 = arith.constant 224 : index
    %c0_9 = arith.constant 0 : index
    %51 = vector.load %arg5[%c224, %c0_9] : memref<280x128xf32, #tpu.memory_space<vmem>>, vector<3x32xf32>
    %c232 = arith.constant 232 : index
    %c0_10 = arith.constant 0 : index
    %52 = vector.load %arg5[%c232, %c0_10] : memref<280x128xf32, #tpu.memory_space<vmem>>, vector<35x32xf32>
    %c272 = arith.constant 272 : index
    %c0_11 = arith.constant 0 : index
    %53 = vector.load %arg5[%c272, %c0_11] : memref<280x128xf32, #tpu.memory_space<vmem>>, vector<1x32xf32>
    %cst = arith.constant dense<0.000000e+00> : vector<6x32xf32>
    %54 = tpu.matmul %44, %45, %cst {dimension_numbers = #tpu.dot_dimension_numbers<[1], [0], [0], [1], [0, 0, 1, 1], [], []>} : vector<6x128xf32>, vector<128x32xf32>, vector<6x32xf32> -> vector<6x32xf32>
    %55 = vector.broadcast %46 : vector<1x32xf32> to vector<6x32xf32>
    %56 = arith.addf %54, %55 : vector<6x32xf32>
    %c0_12 = arith.constant 0 : index
    %c0_13 = arith.constant 0 : index
    %c0_14 = arith.constant 0 : index
    %57 = vector.load %arg2[%c0_12, %c0_13, %c0_14] : memref<1x6x1xf32, #tpu.memory_space<vmem>>, vector<1x6x1xf32>
    %58 = vector.shape_cast %57 : vector<1x6x1xf32> to vector<6x1xf32>
    %59 = vector.broadcast %58 : vector<6x1xf32> to vector<6x33xf32>
    %60 = vector.broadcast %47 : vector<1x33xf32> to vector<6x33xf32>
    %61 = arith.mulf %59, %60 : vector<6x33xf32>
    %cst_15 = arith.constant dense<0.000000e+00> : vector<6x33xf32>
    %62 = tpu.matmul %56, %48, %cst_15 {dimension_numbers = #tpu.dot_dimension_numbers<[1], [0], [0], [1], [0, 0, 1, 1], [], []>} : vector<6x32xf32>, vector<32x33xf32>, vector<6x33xf32> -> vector<6x33xf32>
    %63 = arith.addf %61, %62 : vector<6x33xf32>
    %64 = vector.broadcast %49 : vector<1x33xf32> to vector<6x33xf32>
    %65 = arith.addf %63, %64 : vector<6x33xf32>
    %cst_16 = arith.constant dense<0.000000e+00> : vector<33xf32>
    %66 = vector.multi_reduction <add>, %65, %cst_16 [0] : vector<6x33xf32> to vector<33xf32>
    %67 = vector.shape_cast %66 : vector<33xf32> to vector<1x33xf32>
    %cst_17 = arith.constant 0.166666672 : f32
    %68 = vector.broadcast %cst_17 : f32 to vector<1x33xf32>
    %69 = arith.mulf %67, %68 : vector<1x33xf32>
    %c0_18 = arith.constant 0 : index
    %c0_19 = arith.constant 0 : index
    %c0_20 = arith.constant 0 : index
    %70 = vector.load %arg3[%c0_18, %c0_19, %c0_20] : memref<1x2x3xf32, #tpu.memory_space<vmem>>, vector<1x2x3xf32>
    %71 = vector.shape_cast %70 : vector<1x2x3xf32> to vector<2x3xf32>
    %cst_21 = arith.constant dense<0.000000e+00> : vector<3xf32>
    %72 = vector.multi_reduction <add>, %71, %cst_21 [0] : vector<2x3xf32> to vector<3xf32>
    %73 = vector.shape_cast %72 : vector<3xf32> to vector<1x3xf32>
    %cst_22 = arith.constant 5.000000e-01 : f32
    %74 = vector.broadcast %cst_22 : f32 to vector<1x3xf32>
    %75 = arith.mulf %73, %74 : vector<1x3xf32>
    %cst_23 = arith.constant dense<0.000000e+00> : vector<1x32xf32>
    %76 = tpu.matmul %69, %50, %cst_23 {dimension_numbers = #tpu.dot_dimension_numbers<[1], [0], [0], [1], [0, 0, 1, 1], [], []>} : vector<1x33xf32>, vector<33x32xf32>, vector<1x32xf32> -> vector<1x32xf32>
    %cst_24 = arith.constant dense<0.000000e+00> : vector<1x32xf32>
    %77 = tpu.matmul %75, %51, %cst_24 {dimension_numbers = #tpu.dot_dimension_numbers<[1], [0], [0], [1], [0, 0, 1, 1], [], []>} : vector<1x3xf32>, vector<3x32xf32>, vector<1x32xf32> -> vector<1x32xf32>
    %78 = arith.addf %76, %77 : vector<1x32xf32>
    %c0_25 = arith.constant 0 : index
    %c0_26 = arith.constant 0 : index
    %79 = vector.load %arg4[%c0_25, %c0_26] : memref<1x35xf32, #tpu.memory_space<vmem>>, vector<1x35xf32>
    %cst_27 = arith.constant dense<0.000000e+00> : vector<1x32xf32>
    %80 = tpu.matmul %79, %52, %cst_27 {dimension_numbers = #tpu.dot_dimension_numbers<[1], [0], [0], [1], [0, 0, 1, 1], [], []>} : vector<1x35xf32>, vector<35x32xf32>, vector<1x32xf32> -> vector<1x32xf32>
    %81 = arith.addf %78, %80 : vector<1x32xf32>
    %82 = arith.addf %81, %53 : vector<1x32xf32>
    %c0_28 = arith.constant 0 : index
    %c0_29 = arith.constant 0 : index
    %c0_30 = arith.constant 0 : index
    %83 = vector.load %arg6[%c0_28, %c0_29, %c0_30] : memref<1x1x32xf32, #tpu.memory_space<vmem>>, vector<1x1x32xf32>
    %84 = vector.shape_cast %83 : vector<1x1x32xf32> to vector<1x32xf32>
    %85 = vector.shape_cast %82 : vector<1x32xf32> to vector<1x1x32xf32>
    tpu.vector_store %arg6[%c0_28, %c0_29, %c0_30], %85 {strides = array<i32>} : memref<1x1x32xf32, #tpu.memory_space<vmem>>, vector<1x1x32xf32>,
    return
  }
  func.func @transform_0(%arg0: i32) -> (i32, i32, i32) {
    %c0_i32 = arith.constant 0 : i32
    %c0_i32_0 = arith.constant 0 : i32
    %c0_i32_1 = arith.constant 0 : i32
    return %arg0, %c0_i32, %c0_i32_0 : i32, i32, i32
  }
  func.func @transform_1(%arg0: i32) -> (i32, i32, i32) {
    %c0_i32 = arith.constant 0 : i32
    %c0_i32_0 = arith.constant 0 : i32
    %c0_i32_1 = arith.constant 0 : i32
    return %arg0, %c0_i32, %c0_i32_0 : i32, i32, i32
  }
  func.func @transform_2(%arg0: i32) -> (i32, i32, i32) {
    %c0_i32 = arith.constant 0 : i32
    %c0_i32_0 = arith.constant 0 : i32
    %c0_i32_1 = arith.constant 0 : i32
    return %arg0, %c0_i32, %c0_i32_0 : i32, i32, i32
  }
  func.func @transform_3(%arg0: i32) -> (i32, i32) {
    %c0_i32 = arith.constant 0 : i32
    %c0_i32_0 = arith.constant 0 : i32
    %c0_i32_1 = arith.constant 0 : i32
    return %c0_i32, %c0_i32_0 : i32, i32
  }
  func.func @transform_4(%arg0: i32) -> (i32, i32) {
    %c0_i32 = arith.constant 0 : i32
    %c0_i32_0 = arith.constant 0 : i32
    %c0_i32_1 = arith.constant 0 : i32
    return %c0_i32, %c0_i32_0 : i32, i32
  }
  func.func @transform_5(%arg0: i32) -> (i32, i32, i32) {
    %c0_i32 = arith.constant 0 : i32
    %c0_i32_0 = arith.constant 0 : i32
    %c0_i32_1 = arith.constant 0 : i32
    return %arg0, %c0_i32, %c0_i32_0 : i32, i32, i32
  }
}

</mosaic_0001>

<bundles_post_ra>
// kernel: forward.1
= control target key start
LH: loop header
LB: loop body
LE: loop exit
PB: predicated region body
PF: predicated region fallthrough
CT: control target
= control target key end

     0   :  { %10 = vsyncpa [#allocation3], 0  ;;  %s1160_s18 = smov 0   ;;  %s1273_s0 = inlined_call_operand.vmem [shape: s32[2,6,8], index: 0, kind: input, shape index: {}]   ;;  %s1274_s1 = inlined_call_operand.vmem [shape: f32[2,6,1], index: 1, kind: input, shape index: {}]   ;;  %s1275_s2 = inlined_call_operand.vmem [shape: f32[2,2,3], index: 2, kind: input, shape index: {}]   ;;  %s1276_s3 = inlined_call_operand.vmem [shape: f32[1,35], index: 3, kind: input, shape index: {}]   ;;  %s1277_s4 = inlined_call_operand.hbm [shape: f32[280,128], index: 4, kind: input, shape index: {}]   ;;  %s1278_s5 = inlined_call_operand.vmem [shape: f32[2,1,32], index: 5, kind: output, shape index: {}]  }
   0x1 LB: > { %s1166_s19 = sadd.s32 4294967295, %s1114_s18   ;;  %p860_p0 = scmp.ge.s32.totalorder %s1114_s18, 1  ;;  %s1114_s18 = sphi %s1160_s18, %s16_s18  }
   0x2   : > { %p167_p1 = scmp.lt.s32.totalorder %s1114_s18, 3  ;;  %s1116_s20 = smov [#allocation2]  }
   0x3   : > { %s182_s21 = sshll.u32 %s1116_s20, 4  ;;  %p1279_p3 = scmp.eq.s32.totalorder %s1166_s19, 0  ;;  %s183_s21 = int_to_ptr.vmem [resolvable:$true] %s182_s21 }
   0x4   : > { %p1170_p2 = pnand %p860_p0, %p167_p1  ;;  %s1076_s26 = scalar_lea.hbm %s1277_s4, 4480 }
   0x5   : > { %p1077_p6 = scmp.ne.s32.totalorder %s1277_s4, %s1076_s26  ;;  %p1083_p10 = scmp.lt.u32.totalorder %s1076_s26, %s1277_s4 }
   0x6   : > { %s1281_s22 = scalar_select %p1170_p2, 1, 0 }
   0x7   : > { %p1039_p4 = pneg %p1170_p2 }
   0x9   : > { %p1179_p5 = pnand %p1279_p3, %p1039_p4 }
   0xb   : > { %p1078_p7 = pneg %p1179_p5 }
   0xd   : > { %p1079_p8 = pnand %p1078_p7, %p1077_p6 }
   0xf   : > { %p1080_p9 = pneg %p1079_p8 }
  0x11   : > { %p1085_p11 = pnand %p1083_p10, %p1080_p9 }
  0x13   : > { %1088 = shalt.err (!%p1085_p11)
}
  0x14   : > { %s1089_s6 = scalar_lea.vmem %s183_s21, 4480  ;;  %p1097_p1 = scmp.lt.s32.totalorder %s183_s21, %s183_s21 }
  0x15   : > { %p1090_p12 = scmp.ne.s32.totalorder %s183_s21, %s1089_s6  ;;  %p1098_p4 = scmp.lt.s32.totalorder %s1089_s6, %s1089_s6 }
  0x17   : > { %p1092_p13 = pnand %p1090_p12, %p1078_p7  ;;  %p1099_p3 = por %p1098_p4, %p1097_p1 }
  0x19   : > { %p1093_p0 = pneg %p1092_p13 }
  0x1b   : > { %p1100_p2 = pnand %p1099_p3, %p1093_p0 }
  0x1d   : > { %1103 = shalt.err (!%p1100_p2)
}
  0x1e   : > { %s1117_s7 = smov 128   ;;  %s1118_s8 = smov 8  }
  0x1f   : > { %1042 = dma.hbm_to_vmem [thread:$0]  (!%p1179_p5), %s1277_s4, 4480, %s183_s21, [#allocation3], %s1117_s7, %s1117_s7, %s1118_s8  }
  0x20   : > { %p1283_p6 = scmp.ne.s32.totalorder %s1281_s22, 0 }
  0x21   : > { %p1284_p8 = scmp.eq.s32.totalorder (!%p1283_p6), %s1166_s19, 0 }
  0x22   : > { %219 = sbr.rel (%p1283_p6) target bundleno = 874 (0x36a), region = 40 }
  0x29   : > { %1109 = dma.done.wait (%p1284_p8), [#allocation3], 4480   ;;  %p1285_p7 = pmov %p1284_p8 }
  0x2a   : > { %p252_p2 = scmp.lt.s32.totalorder %s1166_s19, 1  ;;  %v1119_v0 = vmov 2   ;;  %v1120_v1 = vmov 0   ;;  %v1121_v2 = vmov 0.0|0.0   ;;  %v318_v4 = vld [vmem:[#allocation2] sm:$0xff]  ;;  %v319_v5 = vld [vmem:[#allocation2 + $0x8] sm:$0xff]  ;;  %v268_v38 = vlaneseq }
  0x2b   : > { %1111 = vsyncadd (%p1285_p7), [#allocation3], 4294962816  ;;  %1069 = vset.pattern.permute.xlu1 %v1119_v0  ;;  %1067 = vset.pattern.permute.xlu0 %v1120_v1  ;;  %v994_v6 = vpack.c.bf16 %v319_v5, %v318_v4  ;;  %v320_v7 = vld [vmem:[#allocation2 + $0x10] sm:$0xff]  ;;  %v321_v8 = vld [vmem:[#allocation2 + $0x18] sm:$0xff]  ;;  %v1122_v10 = vmov 3   ;;  %v1123_v11 = vmov 1  }
  0x2c   : > { %s1287_s19 = smov (!%p252_p2, %s1166_s19), 1  ;;  %993 = vmatprep.subr.bf16.mxu0 %v1121_v2  ;;  %1017 = vmatprep.subr.bf16.mxu1 %v1121_v2  ;;  %v997_v9 = vpack.c.bf16 %v321_v8, %v320_v7  ;;  %v322_v12 = vld [vmem:[#allocation2 + $0x20] sm:$0xff]  ;;  %v323_v13 = vld [vmem:[#allocation2 + $0x28] sm:$0xff]  ;;  %v324_v15 = vld [vmem:[#allocation2 + $0x30] sm:$0xff]  ;;  %v1124_v17 = vmov 4   ;;  %v1125_v18 = vmov 5  }
  0x2d   : > { %s865_s11 = sshll.u32 %s1287_s19, 3  ;;  %995 = vmatpush3.bf16.msra.mxu0 %v994_v6  ;;  %v1000_v14 = vpack.c.bf16 %v323_v13, %v322_v12  ;;  %v325_v16 = vld [vmem:[#allocation2 + $0x38] sm:$0xff]  ;;  %v326_v20 = vld [vmem:[#allocation2 + $0x40] sm:$0xff]  ;;  %v327_v21 = vld [vmem:[#allocation2 + $0x48] sm:$0xff]  ;;  %v1126_v22 = vmov 6   ;;  %v1127_v26 = vmov 7   ;;  %s266_s28 = scalar_lea.vmem %s1278_s5, %s1287_s19 }
  0x2e   : > { %s255_s14 = scalar_lea.vmem %s1273_s0, %s865_s11  ;;  %996 = vmatprep.subr.bf16.mxu0 %v1121_v2  ;;  %v1003_v19 = vpack.c.bf16 %v325_v16, %v324_v15  ;;  %v1006_v23 = vpack.c.bf16 %v327_v21, %v326_v20  ;;  %v328_v24 = vld [vmem:[#allocation2 + $0x50] sm:$0xff]  ;;  %v329_v25 = vld [vmem:[#allocation2 + $0x58] sm:$0xff]  ;;  %v330_v28 = vld [vmem:[#allocation2 + $0x60] sm:$0xff]  ;;  %vm1128_vm0 = vmmov 0   ;;  %v1129_v33 = vmov 0.0   ;;  %s259_s17 = scalar_lea.vmem %s1274_s1, %s865_s11 }
  0x2f   : > { %v267_v3 = vld [vmem:[%s255_s14] sm:$0x3f]  ;;  %v1009_v27 = vpack.c.bf16 %v329_v25, %v328_v24  ;;  %v331_v29 = vld [vmem:[#allocation2 + $0x68] sm:$0xff]  ;;  %v332_v31 = vld [vmem:[#allocation2 + $0x70] sm:$0xff]  ;;  %948 = vmatprep.mubr.msk.f32.mxu0 %vm1128_vm0, %v1129_v33  ;;  %959 = vmatprep.mubr.msk.f32.mxu1 %vm1128_vm0, %v1129_v33  ;;  %v269_v41 = vand.u32 127, %v268_v38  ;;  %vm438_vm9 = vcmask 261120  }
  0x30   : > { %282 = vperm.xlu1 %1069, %v267_v3   ;;  %271 = vperm.xlu0 %1067, %v267_v3   ;;  %v1012_v30 = vpack.c.bf16 %v331_v29, %v330_v28  ;;  %v333_v32 = vld [vmem:[#allocation2 + $0x78] sm:$0xff]  ;;  %v336_v34 = vld [vmem:[#allocation2 + $0x90] sm:$0xff]  ;;  %v338_v0 = vld [vmem:[#allocation2 + $0xa0] sm:$0xff]  ;;  %s867_s20 = sshll.u32 %s1287_s19, 1  ;;  %vm528_vm10 = vcmask 17408   ;;  %vm541_vm11 = vcmask 1042432  }
  0x31   : > { %998 = vmatpush3.bf16.msra.mxu0 %v997_v9  ;;  %v337_v35 = vld [vmem:[#allocation2 + $0x98] sm:$0xff]  ;;  %v1015_v36 = vpack.c.bf16 %v333_v32, %v332_v31  ;;  %v427_v5 = vld [vmem:[%s259_s17] sm:$0x3f]  ;;  %s263_s23 = scalar_lea.vmem %s1275_s2, %s867_s20  ;;  %vm537_vm12 = vcmask 23552   ;;  %vm619_vm13 = vcmask 1040384   ;;  %vm518_vm14 = vcmask 267264  }
  0x32   : > { %999 = vmatprep.subr.bf16.mxu0 %v1121_v2  ;;  %v1018_v37 = vpack.c.bf16 %v337_v35, %v336_v34  ;;  %v868_v6 = vld [vmem:[#allocation2 + $0x80] ss:$0 sm:$0xff]  ;;  %v345_v25 = vld [vmem:[#allocation2 + $0xd8] sm:$0x1]  ;;  %v871_v29 = vld [vmem:[#allocation2 + $0xb0] ss:$0 sm:$0xff] }
  0x33   : > { %v527_v9 = vld [vmem:[%s263_s23] sm:$0x3]  ;;  %vm615_vm15 = vcmask 269312  }
  0x34   : > { %1070 = vset.pattern.permute.xlu1 %v1122_v10  ;;  %1068 = vset.pattern.permute.xlu0 %v1123_v11  ;;  %v529_v10 = vsel %vm528_vm10, %v527_v9, 0.0  ;;  %v342_v20 = vld [vmem:[#allocation2 + $0xc0] sm:$0xff] }
  0x35   : > { %288 = vperm.xlu1 %1070, %v267_v3   ;;  %276 = vperm.xlu0 %1068, %v267_v3   ;;  %v530_v11 = vrot.slane %v529_v10, 4 }
  0x36   : > { %1001 = vmatpush3.bf16.msra.mxu0 %v1000_v14  ;;  %1019 = vmatpush3.bf16.msra.mxu1 %v1018_v37 }
  0x37   : > { %1002 = vmatprep.subr.bf16.mxu0 %v1121_v2  ;;  %1020 = vmatprep.subr.bf16.mxu1 %v1121_v2  ;;  %v531_v12 = vadd.f32 %v530_v11, %v529_v10 }
  0x39   : > { %1071 = vset.pattern.permute.xlu1 %v1124_v17  ;;  %1072 = vset.pattern.permute.xlu0 %v1125_v18  ;;  %v532_v13 = vrot.slane %v531_v12, 2  ;;  %v346_v17 = vld [vmem:[#allocation2 + $0xe0] sm:$0x7] }
  0x3a   : > { %294 = vperm.xlu1 %1071, %v267_v3   ;;  %300 = vperm.xlu0 %1072, %v267_v3  }
  0x3b   : > { %1004 = vmatpush3.bf16.msra.mxu0 %v1003_v19  ;;  %v533_v14 = vadd.f32 %v532_v13, %v531_v12  ;;  %v341_v19 = vld [vmem:[#allocation2 + $0xb8] sm:$0xff] }
  0x3c   : > { %1005 = vmatprep.subr.bf16.mxu0 %v1121_v2  ;;  %v1024_v21 = vpack.c.bf16 %v342_v20, %v341_v19 }
  0x3d   : > { %v534_v15 = vrot.slane %v533_v14, 1 }
  0x3e   : > { %1073 = vset.pattern.permute.xlu1 %v1126_v22  ;;  %1075 = vset.pattern.permute.xlu0 %v1120_v1  ;;  %v343_v22 = vld [vmem:[#allocation2 + $0xc8] sm:$0xff] }
  0x3f   : > { %306 = vperm.xlu1 %1073, %v267_v3   ;;  %1007 = vmatpush3.bf16.msra.mxu0 %v1006_v23  ;;  %v535_v16 = vadd.f32 %v534_v15, %v533_v14  ;;  %v344_v23 = vld [vmem:[#allocation2 + $0xd0] sm:$0xff] }
  0x40   : > { %1008 = vmatprep.subr.bf16.mxu0 %v1121_v2  ;;  %430 = vperm.xlu0 %1075, %v427_v5   ;;  %v1027_v24 = vpack.c.bf16 %v344_v23, %v343_v22 }
  0x41   : > { %v536_v18 = vmul.f32 0.5, %v535_v16 }
  0x43   : > { %1074 = vset.pattern.permute.xlu1 %v1127_v26  ;;  %1010 = vmatpush3.bf16.msra.mxu0 %v1009_v27  ;;  %v869_v26 = vld [vmem:[#allocation2 + $0x88] ss:$0 sm:$0xff] }
  0x44   : > { %312 = vperm.xlu1 %1074, %v267_v3   ;;  %1011 = vmatprep.subr.bf16.mxu0 %v1121_v2  ;;  %v339_v3 = vld [vmem:[#allocation2 + $0xa8] sm:$0xff] }
  0x45   : > { %v1021_v4 = vpack.c.bf16 %v339_v3, %v338_v0 }
  0x47   : > { %1013 = vmatpush3.bf16.msra.mxu0 %v1012_v30  ;;  %1022 = vmatpush3.bf16.msra.mxu1 %v1021_v4 }
  0x48   : > { %1014 = vmatprep.subr.bf16.mxu0 %v1121_v2  ;;  %962 = vmatprep.subr.mxu1 %v1129_v33 }
  0x4b   : > { %1016 = vmatpush3.bf16.msra.mxu0 %v1015_v36 }
  0xaf   : > { %v283_v39 = vpop.permute.xlu1 %282  ;;  %v272_v40 = vpop.permute.xlu0 %271 }
  0xb0   : > { %vm273_vm1 = vcmp.eq.s32.totalorder %v269_v41, %v272_v40  ;;  %vm284_vm2 = vcmp.eq.s32.totalorder %v269_v41, %v283_v39 }
  0xb1   : > { %v274_v44 = vsel %vm273_vm1, 1, %v1120_v1  ;;  %v285_v47 = vsel %vm284_vm2, 1, %v1120_v1  ;;  %vm694_vm1 = vcmask 285696  }
  0xb4   : > { %v289_v42 = vpop.permute.xlu1 %288  ;;  %v277_v43 = vpop.permute.xlu0 %276 }
  0xb5   : > { %vm278_vm3 = vcmp.eq.s32.totalorder %v269_v41, %v277_v43  ;;  %vm290_vm4 = vcmp.eq.s32.totalorder %v269_v41, %v289_v42  ;;  %v348_v42 = vld [vmem:[#allocation2 + $0xf0] sm:$0xff] }
  0xb6   : > { %v279_v45 = vsel %vm278_vm3, 1, %v1120_v1  ;;  %v291_v51 = vsel %vm290_vm4, 1, %v1120_v1 }
  0xb7   : > { %v280_v46 = vadd.s32 %v279_v45, %v274_v44 }
  0xb9   : > { %v286_v48 = vadd.s32 %v285_v47, %v280_v46  ;;  %v295_v49 = vpop.permute.xlu1 %294  ;;  %v301_v50 = vpop.permute.xlu0 %300  ;;  %v349_v46 = vld [vmem:[#allocation2 + $0xf8] sm:$0xff]  ;;  %v350_v47 = vld [vmem:[#allocation2 + $0x100] sm:$0xff] }
  0xba   : > { %vm296_vm5 = vcmp.eq.s32.totalorder %v269_v41, %v295_v49  ;;  %vm302_vm6 = vcmp.eq.s32.totalorder %v269_v41, %v301_v50  ;;  %v351_v49 = vld [vmem:[#allocation2 + $0x108] sm:$0x7]  ;;  %v693_v50 = vld [vmem:[%s1276_s3] sm:$0x1] }
  0xbb   : > { %v292_v52 = vadd.s32 %v291_v51, %v286_v48  ;;  %v297_v53 = vsel %vm296_vm5, 1, %v1120_v1  ;;  %v303_v55 = vsel %vm302_vm6, 1, %v1120_v1  ;;  %v1033_v48 = vpack.c.bf16 %v350_v47, %v349_v46 }
  0xbd   : > { %v298_v54 = vadd.s32 %v297_v53, %v292_v52 }
  0xbe   : > { %v307_v56 = vpop.permute.xlu1 %306 }
  0xbf   : > { %vm308_vm7 = vcmp.eq.s32.totalorder %v269_v41, %v307_v56  ;;  %v304_v57 = vadd.s32 %v303_v55, %v298_v54  ;;  %v431_v27 = vpop.permute.xlu0 %430  ;;  %v352_v56 = vld [vmem:[#allocation2 + $0x110] sm:$0x1] }
  0xc0   : > { %v309_v58 = vsel %vm308_vm7, 1, %v1120_v1  ;;  %v437_v28 = vmul.f32 %v869_v26, %v431_v27 }
  0xc1   : > { %v310_v60 = vadd.s32 %v309_v58, %v304_v57 }
  0xc3   : > { %v313_v59 = vpop.permute.xlu1 %312 }
  0xc4   : > { %vm314_vm8 = vcmp.eq.s32.totalorder %v269_v41, %v313_v59  ;;  %v347_v41 = vld [vmem:[#allocation2 + $0xe8] sm:$0xff] }
  0xc5   : > { %v315_v61 = vsel %vm314_vm8, 1, %v1120_v1  ;;  %v1030_v44 = vpack.c.bf16 %v348_v42, %v347_v41 }
  0xc6   : > { %v316_v62 = vadd.s32 %v315_v61, %v310_v60 }
  0xc8   : > { %v317_v63 = vcvt.s32.f32 %v316_v62 }
  0xca   : > { %949 = vmatmul.mubr.f32.vlgmr.msra.gmra.mrb[0].mxu0 %v317_v63 }
 0x19d   : > { %v423_v7 = vpop.f32.mrb[0].mxu0 }
 0x19e   : > { %v424_v1 = vadd.f32 %v868_v6, %v423_v7  ;;  %v950_v8 = vpop.f32.mrb[1].mxu0 }
 0x1a0   : > { %960 = vmatmul.mubr.msk.f32.vlgmr.msra.gmra.mrb[0].mxu1 %vm438_vm9, %v424_v1 }
 0x1a1   : > { %964 = vmatprep.mubr.msk.f32.mxu1 %vm1128_vm0, %v1129_v33  ;;  %963 = vmatpush3.msk.msra.mxu1 %vm541_vm11, %v346_v17 }
 0x1a2   : > { %1023 = vmatprep.subr.bf16.mxu1 %v1121_v2 }
 0x1a4   : > { %965 = vmatmul.mubr.msk.f32.vlgmr.msra.gmra.mrb[2].mxu1 %vm537_vm12, %v536_v18 }
 0x1a5   : > { %1025 = vmatpush3.bf16.msra.mxu1 %v1024_v21  ;;  %977 = vmatprep.mubr.msk.f32.mxu1 %vm1128_vm0, %v1129_v33 }
 0x1a6   : > { %1026 = vmatprep.subr.bf16.mxu1 %v1121_v2 }
 0x1a9   : > { %1028 = vmatpush3.bf16.msra.mxu1 %v1027_v24 }
 0x1aa   : > { %975 = vmatprep.subr.mxu1 %v1129_v33 }
 0x1ad   : > { %976 = vmatpush3.msk.msra.mxu1 %vm619_vm13, %v345_v25 }
 0x1ae   : > { %1029 = vmatprep.subr.bf16.mxu1 %v1121_v2 }
 0x273   : > { %v508_v30 = vpop.f32.mrb[0].mxu1 }
 0x274   : > { %v512_v31 = vadd.f32 %v508_v30, %v437_v28  ;;  %v961_v32 = vpop.f32.mrb[1].mxu1 }
 0x276   : > { %v517_v34 = vadd.f32 %v871_v29, %v512_v31 }
 0x277   : > { %v611_v51 = vpop.f32.mrb[2].mxu1 }
 0x278   : > { %v519_v35 = vsel %vm518_vm14, %v517_v34, 0.0  ;;  %v966_v52 = vpop.f32.mrb[3].mxu1 }
 0x279   : > { %v520_v36 = vrot.slane %v519_v35, 4 }
 0x27b   : > { %v521_v37 = vadd.f32 %v520_v36, %v519_v35 }
 0x27d   : > { %v522_v38 = vrot.slane %v521_v37, 2 }
 0x27f   : > { %v523_v39 = vadd.f32 %v522_v38, %v521_v37 }
 0x281   : > { %v524_v40 = vrot.slane %v523_v39, 1 }
 0x283   : > { %v525_v43 = vadd.f32 %v524_v40, %v523_v39 }
 0x285   : > { %v526_v45 = vmul.f32 0.16666667, %v525_v43 }
 0x287   : > { %978 = vmatmul.mubr.msk.f32.vlgmr.msra.gmra.mrb[4].mxu1 %vm615_vm15, %v526_v45 }
 0x288   : > { %1031 = vmatpush3.bf16.msra.mxu1 %v1030_v44  ;;  %990 = vmatprep.mubr.msk.f32.mxu1 %vm1128_vm0, %v1129_v33  ;;  %vm773_vm0 = vcmask 253952  }
 0x289   : > { %1032 = vmatprep.subr.bf16.mxu1 %v1121_v2 }
 0x28c   : > { %1034 = vmatpush3.bf16.msra.mxu1 %v1033_v48 }
 0x28d   : > { %988 = vmatprep.subr.mxu1 %v1129_v33 }
 0x290   : > { %989 = vmatpush3.msk.msra.mxu1 %vm541_vm11, %v351_v49 }
 0x291   : > { %991 = vmatmul.mubr.msk.f32.vlgmr.msra.gmra.mrb[6].mxu1 %vm694_vm1, %v693_v50 }
 0x35a   : > { %v689_v53 = vpop.f32.mrb[4].mxu1 }
 0x35b   : > { %v690_v54 = vadd.f32 %v689_v53, %v611_v51  ;;  %v979_v55 = vpop.f32.mrb[5].mxu1 }
 0x364   : > { %v767_v2 = vpop.f32.mrb[6].mxu1 }
 0x365   : > { %v771_v57 = vadd.f32 %v767_v2, %v690_v54  ;;  %v992_v58 = vpop.f32.mrb[7].mxu1 }
 0x367   : > { %v772_v33 = vadd.f32 %v771_v57, %v352_v56 }
 0x369   : > { %774 = vst.msk [vmem:[%s266_s28] sm:$0x1] %vm773_vm0, %v772_v33 }
 0x36a PF: > { %s16_s18 = sadd.s32 1, %s1114_s18  }
 0x36b   : > { %p13_p3 = scmp.ge.s32.totalorder %s16_s18, 4  }
 0x36d   :  { %15 = sbr.rel (!%p13_p3) target bundleno = 1 (0x1), region = 81 }
 0x374   :  { %792 = vsyncpa [#allocation3], 1 }
 0x375   :  { %794 = vsyncpa [#allocation3 + $0x1], 1 }

</bundles_post_ra>
